<compile_context>
chip_gen: v7x
topology: tpu7x:2x2x1
jax: 0.10.0
libtpu: 0.0.40
codegen_flags: <defaults>
</compile_context>

<pallas_src>
import jax
import jax.numpy as jnp
from jax.experimental import pallas as pl
from jax.experimental.pallas import tpu as pltpu


def _round_up(x, m):
    return ((x + m - 1) // m) * m


# ---------------------------------------------------------------------------
# Kernels: fused  (x @ W.T) * (g/sigma) + bias   (tiled, K-accumulated)
# ---------------------------------------------------------------------------
def _sreparam_kernel_out_acc(scale_ref, x_ref, w_ref, b_ref, o_ref):
    """f32 output: accumulate directly into the resident output tile."""
    # scale_ref: (1,)     SMEM scalar g/sigma
    # x_ref:     (tm, tk) input tile
    # w_ref:     (tk, tn) weight tile, pre-transposed (K, N) layout
    # b_ref:     (1, tn)  bias tile (f32)
    # o_ref:     (tm, tn) f32 output tile, resident across the K grid axis
    k = pl.program_id(2)
    prod = jnp.dot(x_ref[...], w_ref[...], preferred_element_type=jnp.float32)

    @pl.when(k == 0)
    def _():
        o_ref[...] = prod          # no separate zero-init pass

    @pl.when(k != 0)
    def _():
        o_ref[...] += prod

    @pl.when(k == pl.num_programs(2) - 1)
    def _():
        o_ref[...] = o_ref[...] * scale_ref[0] + b_ref[...]


def _sreparam_kernel_scratch_acc(scale_ref, x_ref, w_ref, b_ref, o_ref, acc_ref):
    """non-f32 output: f32 scratch accumulator, cast once on the last K step."""
    k = pl.program_id(2)
    prod = jnp.dot(x_ref[...], w_ref[...], preferred_element_type=jnp.float32)

    @pl.when(k == 0)
    def _():
        acc_ref[...] = prod

    @pl.when(k != 0)
    def _():
        acc_ref[...] += prod

    @pl.when(k == pl.num_programs(2) - 1)
    def _():
        o_ref[...] = (acc_ref[...] * scale_ref[0] + b_ref[...]).astype(o_ref.dtype)


# ---------------------------------------------------------------------------
# Wrapper
# ---------------------------------------------------------------------------
def _vmem_capacity_bytes():
    try:
        return int(pltpu.get_tpu_info().vmem_capacity_bytes)
    except Exception:
        return 64 * 1024 * 1024     # conservative (v7x-sized) fallback


def _pick_tiles(M, N, K, tm, tn, tk, in_itemsize):
    # sublane-packing-aware M alignment: f32 -> 8, bf16 -> 16, int8/fp8 -> 32
    m_align = {1: 32, 2: 16}.get(in_itemsize, 8)
    tn_user = tn is not None
    if in_itemsize <= 2:
        dm, dn, dk = 1024, 1024, 512      # bf16: high arithmetic intensity
    else:
        dm, dn, dk = 512, 512, 512
    tm = dm if tm is None else tm
    tn = dn if tn is None else tn
    tk = dk if tk is None else tk

    tm = min(tm, _round_up(M, m_align))
    tn = min(tn, _round_up(N, 128))
    tk = min(tk, _round_up(K, 128))
    # Prefer a tk that divides K exactly (multiple of 128): avoids the K-pad
    # HBM pass over x and W entirely in the common case.
    if K % 128 == 0 and K % tk != 0:
        cand = (min(tk, K) // 128) * 128
        while cand >= 128:
            if K % cand == 0:
                tk = cand
                break
            cand -= 128
    # Decode-like skew (small M): widen tn so W streams through HBM fewer times.
    if (not tn_user) and M <= 256:
        tn = min(1024, _round_up(N, 128))
    return tm, tn, tk


def sreparam_forward(x, weight, g, sigma, bias, *,
                     tm=None, tn=None, tk=None,
                     compute_dtype=jnp.bfloat16):
    """x: (B, S, K); weight: (N, K) PyTorch-layout; bias: (N,). Returns (B, S, N)."""
    B, S, K = x.shape
    N, Kw = weight.shape
    assert Kw == K
    M = B * S
    out_dtype = x.dtype

    if compute_dtype is None:
        compute_dtype = x.dtype
    x = x.astype(compute_dtype)
    # One-time (K, N) transpose: keeps N on the lane axis of every W tile so the
    # MXU consumes it without per-tile XLU transposes.
    wt = weight.astype(compute_dtype).T

    in_itemsize = jnp.dtype(compute_dtype).itemsize
    out_itemsize = jnp.dtype(out_dtype).itemsize

    tm, tn, tk = _pick_tiles(M, N, K, tm, tn, tk, in_itemsize)

    M_p = _round_up(M, tm)
    N_p = _round_up(N, tn)
    K_p = _round_up(K, tk)

    x2 = x.reshape(M, K)
    if (M_p, K_p) != (M, K):
        x2 = jnp.pad(x2, ((0, M_p - M), (0, K_p - K)))
    if (K_p, N_p) != (K, N):
        wt = jnp.pad(wt, ((0, K_p - K), (0, N_p - N)))
    b = bias.astype(jnp.float32).reshape(1, N)
    if N_p != N:
        b = jnp.pad(b, ((0, 0), (0, N_p - N)))

    scale = (g / sigma).reshape(1).astype(jnp.float32)

    grid = (M_p // tm, N_p // tn, K_p // tk)
    out_is_f32 = out_dtype == jnp.float32

    # VMEM footprint: double-buffered x / W / out tiles (+ f32 accumulator when
    # the output is not f32) + the 8-sublane-padded bias tile.
    vmem_needed = (2 * (tm * tk + tk * tn) * in_itemsize
                   + 2 * tm * tn * out_itemsize
                   + (0 if out_is_f32 else tm * tn * 4)
                   + 2 * 8 * tn * 4)
    vmem_cap = _vmem_capacity_bytes()
    vmem_limit = int(min(vmem_cap * 3 // 4,
                         max(2 * vmem_needed, 32 * 1024 * 1024)))
    vmem_limit = int(min(max(vmem_limit, vmem_needed + (4 << 20)),
                         vmem_cap * 9 // 10))

    # Streamed-bytes model: x is re-read once per N tile, W once per M tile.
    cost = pl.CostEstimate(
        flops=2 * M_p * N_p * K_p,
        transcendentals=0,
        bytes_accessed=(M_p * K_p * in_itemsize * (N_p // tn)
                        + K_p * N_p * in_itemsize * (M_p // tm)
                        + M_p * N_p * out_itemsize))

    in_specs = [
        pl.BlockSpec(memory_space=pltpu.SMEM),              # g / sigma scalar
        pl.BlockSpec((tm, tk), lambda i, j, k: (i, k)),     # x tile
        pl.BlockSpec((tk, tn), lambda i, j, k: (k, j)),     # W^T tile (K, N)
        pl.BlockSpec((1, tn), lambda i, j, k: (0, j)),      # bias tile
    ]
    out_spec = pl.BlockSpec((tm, tn), lambda i, j, k: (i, j))

    if out_is_f32:
        kernel = _sreparam_kernel_out_acc
        scratch = []
    else:
        kernel = _sreparam_kernel_scratch_acc
        scratch = [pltpu.VMEM((tm, tn), jnp.float32)]

    out = pl.pallas_call(
        kernel,
        out_shape=jax.ShapeDtypeStruct((M_p, N_p), out_dtype),
        grid_spec=pltpu.PrefetchScalarGridSpec(
            num_scalar_prefetch=0,
            grid=grid,
            in_specs=in_specs,
            out_specs=out_spec,
            scratch_shapes=scratch),
        compiler_params=pltpu.CompilerParams(
            dimension_semantics=("parallel", "parallel", "arbitrary"),
            vmem_limit_bytes=vmem_limit),
        cost_estimate=cost,
    )(scale, x2, wt, b)

    if (M_p, N_p) != (M, N):
        out = out[:M, :N]
    return out.reshape(B, S, N)


# ---------------------------------------------------------------------------
# Plain-JAX glue: power iteration for sigma / v  (SReparam.update_ / init_)
# This is init-time setup, not the forward hot path.
# ---------------------------------------------------------------------------
def sreparam_power_iteration(weight, v, n_iters=15, eps=1e-12):
    """weight: (N, K), v: (K,).  Returns (sigma, v)."""
    n_iters = max(int(n_iters), 1)

    def op(vv):
        return weight @ vv                       # Linear, no bias

    u = None
    for _ in range(n_iters):
        u = op(v)
        u = u / jnp.maximum(jnp.linalg.norm(u), eps)
        v = weight.T @ u                         # vjp of Linear wrt input
        v = v / jnp.maximum(jnp.linalg.norm(v), eps)
    sigma = jnp.sum(u * op(v))
    return sigma, v


# ---------------------------------------------------------------------------
# Reference (pure JAX) for correctness check
# ---------------------------------------------------------------------------
def sreparam_reference(x, weight, g, sigma, bias):
    y = jnp.einsum("bsk,nk->bsn", x.astype(jnp.float32), weight.astype(jnp.float32))
    y = y * (g / sigma)
    y = y + bias
    return y


if __name__ == "__main__":
    # Small shapes, deliberately NOT tile-aligned, to exercise padding/tiling.
    B, S, K, N = 2, 20, 256, 192

    key = jax.random.PRNGKey(0)
    k_x, k_w, k_v, k_b = jax.random.split(key, 4)

    x = jax.random.normal(k_x, (B, S, K), dtype=jnp.float32)
    # Deterministic "Linear" weight init (synthetic, not a checkpoint load)
    weight = jax.random.normal(k_w, (N, K), dtype=jnp.float32) * (1.0 / jnp.sqrt(K))
    v0 = jax.random.normal(k_v, (K,), dtype=jnp.float32)       # registered v buffer

    g = jnp.ones((), dtype=jnp.float32)                        # learnable gamma, init 1
    # bias is zeros at init in the module; use a nonzero value here so the
    # fused epilogue add is actually exercised by the correctness check.
    bias = jax.random.normal(k_b, (N,), dtype=jnp.float32) * 0.1

    # init_: power iteration with n_iters_init=15 to set sigma (and v)
    sigma, v = sreparam_power_iteration(weight, v0, n_iters=15, eps=1e-12)

    y_ref = sreparam_reference(x, weight, g, sigma, bias)

    # 1) Default path: bf16 compute, f32 accumulation, f32 output
    #    (direct accumulation into the resident output tile, no scratch).
    y1 = jax.block_until_ready(sreparam_forward(x, weight, g, sigma, bias))
    assert y1.shape == (B, S, N)
    assert jnp.allclose(y1, y_ref, atol=5e-2, rtol=5e-2)

    # 2) f32 compute with small explicit tiles: exercises M-tail padding,
    #    N tiling and the multi-step K-axis accumulation path, tight tolerance.
    y2 = jax.block_until_ready(
        sreparam_forward(x, weight, g, sigma, bias,
                         tm=16, tn=128, tk=128, compute_dtype=jnp.float32))
    assert jnp.allclose(y2, y_ref, atol=1e-4, rtol=1e-4)

    # 3) bf16 input -> bf16 output: exercises the f32 scratch-accumulator kernel
    #    with the final downcast epilogue.
    y3 = jax.block_until_ready(
        sreparam_forward(x.astype(jnp.bfloat16), weight, g, sigma, bias))
    assert y3.dtype == jnp.bfloat16
    assert jnp.allclose(y3.astype(jnp.float32), y_ref, atol=7.5e-2, rtol=7.5e-2)

    print("KERNEL_OK")
</pallas_src>

<mosaic_0001>
module attributes {stable_mosaic.version = 11 : i64} {
  func.func @_sreparam_kernel_out_acc(%arg0: i32, %arg1: i32, %arg2: i32, %arg3: memref<1xf32, #tpu.memory_space<smem>>, %arg4: memref<48x256xbf16, #tpu.memory_space<vmem>>, %arg5: memref<256x256xbf16, #tpu.memory_space<vmem>>, %arg6: memref<1x256xf32, #tpu.memory_space<vmem>>, %arg7: memref<48x256xf32, #tpu.memory_space<vmem>>) attributes {dimension_semantics = [#tpu.dimension_semantics<parallel>, #tpu.dimension_semantics<parallel>, #tpu.dimension_semantics<arbitrary>], iteration_bounds = array<i64: 1, 1, 1>, scalar_prefetch = 0 : i64, scratch_operands = 0 : i64, tpu.core_type = #tpu.core_type<tc>, window_params = [{transform_indices = @transform_0, window_bounds = array<i64: 1>}, {transform_indices = @transform_1, window_bounds = array<i64: 48, 256>}, {transform_indices = @transform_2, window_bounds = array<i64: 256, 256>}, {transform_indices = @transform_3, window_bounds = array<i64: 1, 256>}, {transform_indices = @transform_4, window_bounds = array<i64: 48, 256>}]} {
    %c0 = arith.constant 0 : index
    %c0_0 = arith.constant 0 : index
    %0 = vector.load %arg4[%c0, %c0_0] : memref<48x256xbf16, #tpu.memory_space<vmem>>, vector<48x256xbf16>
    %c0_1 = arith.constant 0 : index
    %c0_2 = arith.constant 0 : index
    %1 = vector.load %arg5[%c0_1, %c0_2] : memref<256x256xbf16, #tpu.memory_space<vmem>>, vector<256x256xbf16>
    %cst = arith.constant dense<0.000000e+00> : vector<48x256xf32>
    %2 = tpu.matmul %0, %1, %cst {dimension_numbers = #tpu.dot_dimension_numbers<[1], [0], [0], [1], [0, 0, 1, 1], [], []>} : vector<48x256xbf16>, vector<256x256xbf16>, vector<48x256xf32> -> vector<48x256xf32>
    %c0_i32 = arith.constant 0 : i32
    %3 = arith.cmpi eq, %arg2, %c0_i32 : i32
    %4 = arith.extui %3 : i1 to i32
    %c0_i32_3 = arith.constant 0 : i32
    %5 = arith.cmpi ne, %4, %c0_i32_3 : i32
    scf.if %5 {
      %c0_8 = arith.constant 0 : index
      %c0_9 = arith.constant 0 : index
      %12 = vector.load %arg7[%c0_8, %c0_9] : memref<48x256xf32, #tpu.memory_space<vmem>>, vector<48x256xf32>
      tpu.vector_store %arg7[%c0_8, %c0_9], %2 {strides = array<i32>} : memref<48x256xf32, #tpu.memory_space<vmem>>, vector<48x256xf32>,
    } else {
    }
    %c0_i32_4 = arith.constant 0 : i32
    %6 = arith.cmpi ne, %arg2, %c0_i32_4 : i32
    %7 = arith.extui %6 : i1 to i32
    %c0_i32_5 = arith.constant 0 : i32
    %8 = arith.cmpi ne, %7, %c0_i32_5 : i32
    scf.if %8 {
      %c0_8 = arith.constant 0 : index
      %c0_9 = arith.constant 0 : index
      %12 = vector.load %arg7[%c0_8, %c0_9] : memref<48x256xf32, #tpu.memory_space<vmem>>, vector<48x256xf32>
      %13 = arith.addf %12, %2 : vector<48x256xf32>
      %c0_10 = arith.constant 0 : index
      %c0_11 = arith.constant 0 : index
      %14 = vector.load %arg7[%c0_10, %c0_11] : memref<48x256xf32, #tpu.memory_space<vmem>>, vector<48x256xf32>
      tpu.vector_store %arg7[%c0_10, %c0_11], %13 {strides = array<i32>} : memref<48x256xf32, #tpu.memory_space<vmem>>, vector<48x256xf32>,
    } else {
    }
    %c0_i32_6 = arith.constant 0 : i32
    %9 = arith.cmpi eq, %arg2, %c0_i32_6 : i32
    %10 = arith.extui %9 : i1 to i32
    %c0_i32_7 = arith.constant 0 : i32
    %11 = arith.cmpi ne, %10, %c0_i32_7 : i32
    scf.if %11 {
      %c0_8 = arith.constant 0 : index
      %c0_9 = arith.constant 0 : index
      %12 = vector.load %arg7[%c0_8, %c0_9] : memref<48x256xf32, #tpu.memory_space<vmem>>, vector<48x256xf32>
      %c0_10 = arith.constant 0 : index
      %13 = memref.load %arg3[%c0_10] : memref<1xf32, #tpu.memory_space<smem>>
      %14 = vector.broadcast %13 : f32 to vector<48x256xf32>
      %15 = arith.mulf %12, %14 : vector<48x256xf32>
      %c0_11 = arith.constant 0 : index
      %c0_12 = arith.constant 0 : index
      %16 = vector.load %arg6[%c0_11, %c0_12] : memref<1x256xf32, #tpu.memory_space<vmem>>, vector<1x256xf32>
      %17 = vector.broadcast %16 : vector<1x256xf32> to vector<48x256xf32>
      %18 = arith.addf %15, %17 : vector<48x256xf32>
      %c0_13 = arith.constant 0 : index
      %c0_14 = arith.constant 0 : index
      %19 = vector.load %arg7[%c0_13, %c0_14] : memref<48x256xf32, #tpu.memory_space<vmem>>, vector<48x256xf32>
      tpu.vector_store %arg7[%c0_13, %c0_14], %18 {strides = array<i32>} : memref<48x256xf32, #tpu.memory_space<vmem>>, vector<48x256xf32>,
    } else {
    }
    return
  }
  func.func @transform_0(%arg0: i32, %arg1: i32, %arg2: i32) -> i32 {
    %c0_i32 = arith.constant 0 : i32
    %c0_i32_0 = arith.constant 0 : i32
    return %c0_i32 : i32
  }
  func.func @transform_1(%arg0: i32, %arg1: i32, %arg2: i32) -> (i32, i32) {
    %c0_i32 = arith.constant 0 : i32
    return %arg0, %arg2 : i32, i32
  }
  func.func @transform_2(%arg0: i32, %arg1: i32, %arg2: i32) -> (i32, i32) {
    %c0_i32 = arith.constant 0 : i32
    return %arg2, %arg1 : i32, i32
  }
  func.func @transform_3(%arg0: i32, %arg1: i32, %arg2: i32) -> (i32, i32) {
    %c0_i32 = arith.constant 0 : i32
    %c0_i32_0 = arith.constant 0 : i32
    return %c0_i32, %arg1 : i32, i32
  }
  func.func @transform_4(%arg0: i32, %arg1: i32, %arg2: i32) -> (i32, i32) {
    %c0_i32 = arith.constant 0 : i32
    return %arg0, %arg1 : i32, i32
  }
}

</mosaic_0001>

<bundles_post_ra>
// kernel: tpu_custom_call.1
= control target key start
LH: loop header
LB: loop body
LE: loop exit
PB: predicated region body
PF: predicated region fallthrough
CT: control target
= control target key end

     0   :  { %10 = vsyncpa [#allocation4], 0  ;;  %s757_s0 = inlined_call_operand.<no memory space> [shape: f32[1], index: 0, kind: input, shape index: {}]   ;;  %s758_s1 = inlined_call_operand.hbm [shape: bf16[48,256], index: 1, kind: input, shape index: {}]   ;;  %s759_s2 = inlined_call_operand.hbm [shape: bf16[256,256], index: 2, kind: input, shape index: {}]   ;;  %s760_s3 = inlined_call_operand.vmem [shape: f32[1,256], index: 3, kind: input, shape index: {}]   ;;  %s761_s4 = inlined_call_operand.hbm [shape: f32[48,256], index: 4, kind: output, shape index: {}]  }
   0x1   :  { %11 = vsyncpa [#allocation7], 0 }
   0x2   :  { %12 = vsyncpa [#allocation5], 0  ;;  %s683_s15 = smov [#allocation3]   ;;  %s611_s19 = scalar_lea.hbm %s758_s1, 768 }
   0x3   :  { %s20_s16 = sshll.u32 %s683_s15, 4  ;;  %p612_p0 = scmp.ne.s32.totalorder %s758_s1, %s611_s19  ;;  %s21_s16 = int_to_ptr.vmem [resolvable:$true] %s20_s16 }
   0x4   :  { %p615_p1 = scmp.lt.u32.totalorder %s611_s19, %s758_s1 }
   0x6   :  { %p617_p2 = pnand %p615_p1, %p612_p0 }
   0x8   :  { %620 = shalt.err (!%p617_p2)
}
   0x9   :  { %s621_s24 = scalar_lea.vmem %s21_s16, 768  ;;  %p626_p4 = scmp.lt.s32.totalorder %s21_s16, %s21_s16 }
   0xa   :  { %p622_p3 = scmp.ne.s32.totalorder %s21_s16, %s621_s24  ;;  %p627_p5 = scmp.lt.s32.totalorder %s621_s24, %s621_s24 }
   0xc   :  { %p628_p6 = por %p627_p5, %p626_p4 }
   0xe   :  { %p629_p7 = pnand %p628_p6, %p622_p3 }
  0x10   :  { %632 = shalt.err (!%p629_p7)
}
  0x11   :  { %s684_s25 = smov 128   ;;  %s685_s26 = smov 8  }
  0x12   :  { %26 = dma.hbm_to_vmem [thread:$0]  %s758_s1, 768, %s21_s16, [#allocation4], %s684_s25, %s684_s25, %s685_s26  }
  0x13   :  { %s686_s29 = smov [#allocation6]   ;;  %s633_s7 = scalar_lea.hbm %s759_s2, 4096 }
  0x14   :  { %s32_s30 = sshll.u32 %s686_s29, 4  ;;  %p634_p8 = scmp.ne.s32.totalorder %s759_s2, %s633_s7  ;;  %s33_s30 = int_to_ptr.vmem [resolvable:$true] %s32_s30 }
  0x15   :  { %p637_p9 = scmp.lt.u32.totalorder %s633_s7, %s759_s2 }
  0x17   :  { %p639_p10 = pnand %p637_p9, %p634_p8 }
  0x19   :  { %642 = shalt.err (!%p639_p10)
}
  0x1a   :  { %s643_s12 = scalar_lea.vmem %s33_s30, 4096  ;;  %p648_p12 = scmp.lt.s32.totalorder %s33_s30, %s33_s30 }
  0x1b   :  { %p644_p11 = scmp.ne.s32.totalorder %s33_s30, %s643_s12  ;;  %p649_p13 = scmp.lt.s32.totalorder %s643_s12, %s643_s12 }
  0x1d   :  { %p650_p0 = por %p649_p13, %p648_p12 }
  0x1f   :  { %p651_p1 = pnand %p650_p0, %p644_p11 }
  0x21   :  { %654 = shalt.err (!%p651_p1)
}
  0x22   :  { %38 = dma.hbm_to_vmem [thread:$0]  %s759_s2, 4096, %s33_s30, [#allocation7], %s684_s25, %s684_s25, %s685_s26  }
  0x23   :  { %677 = dma.done.wait [#allocation4], 768  }
  0x24   :  { %678 = vsyncadd [#allocation4], 4294966528 }
  0x25   :  { %679 = dma.done.wait [#allocation7], 4096  }
  0x26   :  { %680 = vsyncadd [#allocation7], 4294963200  ;;  %v554_v0 = vld [vmem:[#allocation6 + $0x4] ss:$8 sps:$4 sm:$0xff]   ;;  %v556_v1 = vld [vmem:[#allocation6] ss:$8 sps:$4 sm:$0xff]   ;;  %v425_v38 = vlaneseq  ;;  %v410_v43 = vstv %s757_s0 }
  0x27   :  { %515 = vmatprep.subr.bf16.mxu1 %v554_v0  ;;  %v557_v2 = vld [vmem:[#allocation6 + $0x14] ss:$8 sps:$4 sm:$0xff]   ;;  %275 = vmatprep.subr.bf16.mxu0 %v554_v0  ;;  %v559_v3 = vld [vmem:[#allocation6 + $0x10] ss:$8 sps:$4 sm:$0xff]   ;;  %v560_v4 = vld [vmem:[#allocation6 + $0x24] ss:$8 sps:$4 sm:$0xff]  }
  0x28   :  { %531 = vmatpush1.bf16.msra.mxu1 %v556_v1  ;;  %276 = vmatpush1.bf16.msra.mxu0 %v556_v1  ;;  %v562_v5 = vld [vmem:[#allocation6 + $0x20] ss:$8 sps:$4 sm:$0xff]   ;;  %v563_v6 = vld [vmem:[#allocation6 + $0x34] ss:$8 sps:$4 sm:$0xff]   ;;  %v565_v7 = vld [vmem:[#allocation6 + $0x30] ss:$8 sps:$4 sm:$0xff]  }
  0x29   :  { %516 = vmatprep.subr.bf16.mxu1 %v557_v2  ;;  %277 = vmatprep.subr.bf16.mxu0 %v557_v2  ;;  %v566_v8 = vld [vmem:[#allocation6 + $0x44] ss:$8 sps:$4 sm:$0xff]   ;;  %v568_v9 = vld [vmem:[#allocation6 + $0x40] ss:$8 sps:$4 sm:$0xff]   ;;  %v569_v10 = vld [vmem:[#allocation6 + $0x54] ss:$8 sps:$4 sm:$0xff]  }
  0x2a   :  { %v571_v11 = vld [vmem:[#allocation6 + $0x50] ss:$8 sps:$4 sm:$0xff]   ;;  %v572_v12 = vld [vmem:[#allocation6 + $0x64] ss:$8 sps:$4 sm:$0xff]   ;;  %v574_v14 = vld [vmem:[#allocation6 + $0x60] ss:$8 sps:$4 sm:$0xff]  }
  0x2b   :  { %v604_v13 = vld [vmem:[#allocation3 + $0x14] ss:$8 sps:$4 sm:$0xff]   ;;  %v607_v15 = vld [vmem:[#allocation3 + $0x4] ss:$8 sps:$4 sm:$0xff]   ;;  %v577_v17 = vld [vmem:[#allocation6 + $0x70] ss:$8 sps:$4 sm:$0xff]  }
  0x2c   :  { %532 = vmatpush1.bf16.msra.mxu1 %v559_v3  ;;  %278 = vmatpush1.bf16.msra.mxu0 %v559_v3  ;;  %v575_v16 = vld [vmem:[#allocation6 + $0x74] ss:$8 sps:$4 sm:$0xff]   ;;  %v578_v18 = vld [vmem:[#allocation6 + $0x84] ss:$8 sps:$4 sm:$0xff]   ;;  %v580_v19 = vld [vmem:[#allocation6 + $0x80] ss:$8 sps:$4 sm:$0xff]  }
  0x2d   :  { %517 = vmatprep.subr.bf16.mxu1 %v560_v4  ;;  %279 = vmatprep.subr.bf16.mxu0 %v560_v4  ;;  %v581_v20 = vld [vmem:[#allocation6 + $0x94] ss:$8 sps:$4 sm:$0xff]   ;;  %v583_v21 = vld [vmem:[#allocation6 + $0x90] ss:$8 sps:$4 sm:$0xff]   ;;  %v584_v22 = vld [vmem:[#allocation6 + $0xa4] ss:$8 sps:$4 sm:$0xff]  }
  0x2e   :  { %317 = vmatprep.mubr.bf16.mxu1 %v604_v13  ;;  %307 = vmatprep.mubr.bf16.mxu0 %v607_v15  ;;  %v586_v23 = vld [vmem:[#allocation6 + $0xa0] ss:$8 sps:$4 sm:$0xff]   ;;  %v587_v24 = vld [vmem:[#allocation6 + $0xb4] ss:$8 sps:$4 sm:$0xff]   ;;  %v589_v25 = vld [vmem:[#allocation6 + $0xb0] ss:$8 sps:$4 sm:$0xff]  }
  0x2f   :  { %v590_v26 = vld [vmem:[#allocation6 + $0xc4] ss:$8 sps:$4 sm:$0xff]   ;;  %v592_v27 = vld [vmem:[#allocation6 + $0xc0] ss:$8 sps:$4 sm:$0xff]   ;;  %v593_v28 = vld [vmem:[#allocation6 + $0xd4] ss:$8 sps:$4 sm:$0xff]  }
  0x30   :  { %533 = vmatpush1.bf16.msra.mxu1 %v562_v5  ;;  %280 = vmatpush1.bf16.msra.mxu0 %v562_v5  ;;  %v595_v29 = vld [vmem:[#allocation6 + $0xd0] ss:$8 sps:$4 sm:$0xff]   ;;  %v596_v30 = vld [vmem:[#allocation6 + $0xe4] ss:$8 sps:$4 sm:$0xff]   ;;  %v598_v31 = vld [vmem:[#allocation6 + $0xe0] ss:$8 sps:$4 sm:$0xff]  }
  0x31   :  { %518 = vmatprep.subr.bf16.mxu1 %v563_v6  ;;  %281 = vmatprep.subr.bf16.mxu0 %v563_v6  ;;  %v599_v32 = vld [vmem:[#allocation6 + $0xf4] ss:$8 sps:$4 sm:$0xff]   ;;  %v601_v33 = vld [vmem:[#allocation6 + $0xf0] ss:$8 sps:$4 sm:$0xff]   ;;  %v602_v34 = vld [vmem:[#allocation3 + $0x10] ss:$8 sps:$4 sm:$0xff]  }
  0x32   :  { %v605_v35 = vld [vmem:[#allocation3] ss:$8 sps:$4 sm:$0xff]   ;;  %v608_v36 = vld [vmem:[#allocation3 + $0x24] ss:$8 sps:$4 sm:$0xff]   ;;  %v426_v39 = vshrl.u32 %v425_v38, 7  ;;  %s687_s0 = smov [#allocation8]  }
  0x33   :  { %v610_v37 = vld [vmem:[#allocation3 + $0x20] ss:$8 sps:$4 sm:$0xff]  }
  0x34   :  { %534 = vmatpush1.bf16.msra.mxu1 %v565_v7  ;;  %282 = vmatpush1.bf16.msra.mxu0 %v565_v7  ;;  %v427_v40 = vsub.s32 0, %v426_v39  ;;  %v423_v41 = vld [vmem:[%s760_s3] sm:$0x3]  ;;  %v431_v42 = vsub.s32 1, %v426_v39  ;;  %s464_s3 = sshll.u32 %s687_s0, 4  ;;  %s465_s3 = int_to_ptr.vmem [resolvable:$true] %s464_s3 }
  0x35   :  { %519 = vmatprep.subr.bf16.mxu1 %v566_v8  ;;  %283 = vmatprep.subr.bf16.mxu0 %v566_v8  ;;  %s655_s17 = scalar_lea.vmem %s465_s3, 1536  ;;  %p660_p3 = scmp.lt.s32.totalorder %s465_s3, %s465_s3 }
  0x36   :  { %v428_v44 = vrot.slane %v423_v41, %v427_v40  ;;  %v432_v46 = vrot.slane %v423_v41, %v431_v42  ;;  %p656_p2 = scmp.ne.s32.totalorder %s465_s3, %s655_s17  ;;  %p661_p4 = scmp.lt.s32.totalorder %s655_s17, %s655_s17 }
  0x38   :  { %535 = vmatpush1.bf16.msra.mxu1 %v568_v9  ;;  %284 = vmatpush1.bf16.msra.mxu0 %v568_v9  ;;  %p662_p5 = por %p661_p4, %p660_p3 }
  0x39   :  { %520 = vmatprep.subr.bf16.mxu1 %v569_v10  ;;  %285 = vmatprep.subr.bf16.mxu0 %v569_v10 }
  0x3a   :  { %p663_p6 = pnand %p662_p5, %p656_p2 }
  0x3c   :  { %536 = vmatpush1.bf16.msra.mxu1 %v571_v11  ;;  %286 = vmatpush1.bf16.msra.mxu0 %v571_v11 }
  0x3d   :  { %521 = vmatprep.subr.bf16.mxu1 %v572_v12  ;;  %287 = vmatprep.subr.bf16.mxu0 %v572_v12 }
  0x40   :  { %537 = vmatpush1.bf16.msra.mxu1 %v574_v14  ;;  %288 = vmatpush1.bf16.msra.mxu0 %v574_v14 }
  0x41   :  { %522 = vmatprep.subr.bf16.mxu1 %v575_v16  ;;  %289 = vmatprep.subr.bf16.mxu0 %v575_v16 }
  0x44   :  { %538 = vmatpush1.bf16.msra.mxu1 %v577_v17  ;;  %290 = vmatpush1.bf16.msra.mxu0 %v577_v17 }
  0x45   :  { %523 = vmatprep.subr.bf16.mxu1 %v578_v18  ;;  %291 = vmatprep.subr.bf16.mxu0 %v578_v18 }
  0x48   :  { %539 = vmatpush1.bf16.msra.mxu1 %v580_v19  ;;  %292 = vmatpush1.bf16.msra.mxu0 %v580_v19 }
  0x49   :  { %524 = vmatprep.subr.bf16.mxu1 %v581_v20  ;;  %293 = vmatprep.subr.bf16.mxu0 %v581_v20 }
  0x4c   :  { %540 = vmatpush1.bf16.msra.mxu1 %v583_v21  ;;  %294 = vmatpush1.bf16.msra.mxu0 %v583_v21 }
  0x4d   :  { %525 = vmatprep.subr.bf16.mxu1 %v584_v22  ;;  %295 = vmatprep.subr.bf16.mxu0 %v584_v22 }
  0x50   :  { %541 = vmatpush1.bf16.msra.mxu1 %v586_v23  ;;  %296 = vmatpush1.bf16.msra.mxu0 %v586_v23 }
  0x51   :  { %526 = vmatprep.subr.bf16.mxu1 %v587_v24  ;;  %297 = vmatprep.subr.bf16.mxu0 %v587_v24 }
  0x54   :  { %542 = vmatpush1.bf16.msra.mxu1 %v589_v25  ;;  %298 = vmatpush1.bf16.msra.mxu0 %v589_v25 }
  0x55   :  { %527 = vmatprep.subr.bf16.mxu1 %v590_v26  ;;  %299 = vmatprep.subr.bf16.mxu0 %v590_v26 }
  0x58   :  { %543 = vmatpush1.bf16.msra.mxu1 %v592_v27  ;;  %300 = vmatpush1.bf16.msra.mxu0 %v592_v27 }
  0x59   :  { %528 = vmatprep.subr.bf16.mxu1 %v593_v28  ;;  %301 = vmatprep.subr.bf16.mxu0 %v593_v28 }
  0x5c   :  { %544 = vmatpush1.bf16.msra.mxu1 %v595_v29  ;;  %302 = vmatpush1.bf16.msra.mxu0 %v595_v29 }
  0x5d   :  { %529 = vmatprep.subr.bf16.mxu1 %v596_v30  ;;  %303 = vmatprep.subr.bf16.mxu0 %v596_v30 }
  0x60   :  { %545 = vmatpush1.bf16.msra.mxu1 %v598_v31  ;;  %304 = vmatpush1.bf16.msra.mxu0 %v598_v31 }
  0x61   :  { %530 = vmatprep.subr.bf16.mxu1 %v599_v32  ;;  %305 = vmatprep.subr.bf16.mxu0 %v599_v32 }
  0x64   :  { %546 = vmatpush1.bf16.msra.mxu1 %v601_v33  ;;  %306 = vmatpush1.bf16.msra.mxu0 %v601_v33 }
  0x67   :  { %318 = vmatmul.mubr.bf16.vlgmr.msra.gmra.mrb[0].mxu1 %v602_v34  ;;  %308 = vmatmul.mubr.bf16.vlgmr.msra.gmra.mrb[0].mxu0 %v605_v35 }
  0x68   :  { %327 = vmatprep.mubr.bf16.mxu1 %v608_v36 }
  0x6f   :  { %328 = vmatmul.mubr.bf16.gmra.mrb[4].mxu1 %v610_v37 }
 0x13a   :  { %v319_v45 = vpop.f32.mrb[0].mxu1  ;;  %v309_v47 = vpop.f32.mrb[0].mxu0 }
 0x13b   :  { %v415_v48 = vmul.f32 %v410_v43, %v319_v45  ;;  %v321_v49 = vpop.f32.mrb[1].mxu1  ;;  %v411_v50 = vmul.f32 %v410_v43, %v309_v47  ;;  %v311_v51 = vpop.f32.mrb[1].mxu0 }
 0x13c   :  { %v416_v52 = vmul.f32 %v410_v43, %v321_v49  ;;  %v323_v53 = vpop.f32.mrb[2].mxu1  ;;  %v412_v54 = vmul.f32 %v410_v43, %v311_v51  ;;  %v313_v55 = vpop.f32.mrb[2].mxu0 }
 0x13d   :  { %v439_v56 = vadd.f32 %v428_v44, %v415_v48  ;;  %v417_v57 = vmul.f32 %v410_v43, %v323_v53  ;;  %v325_v58 = vpop.f32.mrb[3].mxu1  ;;  %v435_v59 = vadd.f32 %v428_v44, %v411_v50  ;;  %v413_v60 = vmul.f32 %v410_v43, %v313_v55  ;;  %v315_v61 = vpop.f32.mrb[3].mxu0 }
 0x13e   :  { %v440_v62 = vadd.f32 %v432_v46, %v416_v52  ;;  %v418_v63 = vmul.f32 %v410_v43, %v325_v58  ;;  %v436_v0 = vadd.f32 %v432_v46, %v412_v54  ;;  %v414_v1 = vmul.f32 %v410_v43, %v315_v61 }
 0x13f   :  { %451 = vst [vmem:[#allocation8 + $0x20] sm:$0xff] %v439_v56  ;;  %v441_v2 = vadd.f32 %v428_v44, %v417_v57  ;;  %447 = vst [vmem:[#allocation8] sm:$0xff] %v435_v59  ;;  %v437_v3 = vadd.f32 %v428_v44, %v413_v60 }
 0x140   :  { %452 = vst [vmem:[#allocation8 + $0x28] sm:$0xff] %v440_v62  ;;  %v442_v4 = vadd.f32 %v432_v46, %v418_v63  ;;  %448 = vst [vmem:[#allocation8 + $0x8] sm:$0xff] %v436_v0  ;;  %v438_v5 = vadd.f32 %v432_v46, %v414_v1 }
 0x141   :  { %453 = vst [vmem:[#allocation8 + $0x30] sm:$0xff] %v441_v2  ;;  %449 = vst [vmem:[#allocation8 + $0x10] sm:$0xff] %v437_v3 }
 0x142   :  { %454 = vst [vmem:[#allocation8 + $0x38] sm:$0xff] %v442_v4  ;;  %450 = vst [vmem:[#allocation8 + $0x18] sm:$0xff] %v438_v5  ;;  %v329_v6 = vpop.f32.mrb[4].mxu1 }
 0x143   :  { %v419_v7 = vmul.f32 %v410_v43, %v329_v6  ;;  %v331_v8 = vpop.f32.mrb[5].mxu1 }
 0x144   :  { %v420_v9 = vmul.f32 %v410_v43, %v331_v8  ;;  %v333_v10 = vpop.f32.mrb[6].mxu1 }
 0x145   :  { %v443_v11 = vadd.f32 %v428_v44, %v419_v7  ;;  %v421_v12 = vmul.f32 %v410_v43, %v333_v10  ;;  %v335_v13 = vpop.f32.mrb[7].mxu1 }
 0x146   :  { %v444_v14 = vadd.f32 %v432_v46, %v420_v9  ;;  %v422_v15 = vmul.f32 %v410_v43, %v335_v13 }
 0x147   :  { %455 = vst [vmem:[#allocation8 + $0x40] sm:$0xff] %v443_v11  ;;  %v445_v16 = vadd.f32 %v428_v44, %v421_v12 }
 0x148   :  { %456 = vst [vmem:[#allocation8 + $0x48] sm:$0xff] %v444_v14  ;;  %v446_v17 = vadd.f32 %v432_v46, %v422_v15 }
 0x149   :  { %457 = vst [vmem:[#allocation8 + $0x50] sm:$0xff] %v445_v16 }
 0x14a   :  { %458 = vst [vmem:[#allocation8 + $0x58] sm:$0xff] %v446_v17 }
 0x14b   :  { %666 = shalt.err (!%p663_p6)
}
 0x14c   :  { %s667_s20 = scalar_lea.hbm %s761_s4, 1536 }
 0x14d   :  { %p668_p7 = scmp.ne.s32.totalorder %s761_s4, %s667_s20  ;;  %p671_p8 = scmp.lt.u32.totalorder %s667_s20, %s761_s4 }
 0x14f   :  { %p673_p9 = pnand %p671_p8, %p668_p7 }
 0x151   :  { %676 = shalt.err (!%p673_p9)
}
 0x152   :  { %s688_s25 = smov 256   ;;  %s689_s26 = smov 16  }
 0x153   :  { %470 = dma.vmem_to_hbm [thread:$0]  %s465_s3, 1536, %s761_s4, [#allocation5], %s688_s25, %s688_s25, %s689_s26  }
 0x154   :  { %681 = dma.done.wait [#allocation5], 1536  }
 0x155   :  { %682 = vsyncadd [#allocation5], 4294965760 }
 0x156   :  { %474 = vsyncpa [#allocation4], 1 }
 0x157   :  { %475 = vsyncpa [#allocation7], 1 }
 0x158   :  { %476 = vsyncpa [#allocation5], 1 }

</bundles_post_ra>
